<compile_context>
chip_gen: v5e
topology: v5e:2x2
jax: 0.10.0
libtpu: 0.0.40
codegen_flags: <defaults>
</compile_context>

<pallas_src>
import math
import functools

import jax
import jax.numpy as jnp
from jax import lax
from jax.experimental import pallas as pl
from jax.experimental.pallas import tpu as pltpu

# Pinyin label-space sizes (Chinese initials / finals / tones).
SM_SIZE, YM_SIZE, SD_SIZE = 24, 34, 6
HEADS_OUT = SM_SIZE + YM_SIZE + SD_SIZE          # 64 (padded to 128 lanes at prep)
LN_EPS = 1e-12                                   # BERT LayerNorm eps
_INV_SQRT2 = 1.0 / math.sqrt(2.0)
_VMEM_LIMIT = 64 << 20                           # <= v7x physical 64 MiB


def _round_up(x, m):
    return ((x + m - 1) // m) * m


def _pick_row_tile(n_rows, tm_max, min_steps=1):
    """Largest 16-aligned row tile <= tm_max (bf16 packs 16 sublanes/vreg),
    shrunk (floor 128) if the resulting 1-D grid would have < min_steps."""
    tm = max(16, min(tm_max, _round_up(n_rows, 16)))
    while tm > 128 and pl.cdiv(n_rows, tm) < min_steps:
        tm //= 2
    return tm


def _pick_col_tile(f_padded, tn_max):
    """Largest 128-multiple column tile <= tn_max that divides f_padded."""
    tn = max(128, min(tn_max, f_padded) // 128 * 128)
    while f_padded % tn != 0:
        tn -= 128
    return tn


# ---------------------------------------------------------------------------
# K1: fused dual BertPredictionHeadTransform (dense -> erf-GELU -> LayerNorm)
# ---------------------------------------------------------------------------
def _dual_transform_kernel(x_ref,
                           wc_ref, bc_ref, gc_ref, betac_ref,
                           wp_ref, bp_ref, gp_ref, betap_ref,
                           hc_ref, hp_ref):
    x = x_ref[...]                                          # (tm, H) bf16

    def _transform(w_ref, b_ref, g_ref, beta_ref):
        h = jnp.dot(x, w_ref[...], preferred_element_type=jnp.float32)
        h = h + b_ref[...]                                  # f32 bias (1, H)
        # exact erf-based GELU (matches torch.nn.functional.gelu default)
        h = 0.5 * h * (1.0 + lax.erf(h * _INV_SQRT2))
        # two-pass LayerNorm statistics (numerically robust)
        mean = jnp.mean(h, axis=-1, keepdims=True)
        cent = h - mean
        var = jnp.mean(cent * cent, axis=-1, keepdims=True)
        h = cent * lax.rsqrt(var + LN_EPS)
        return h * g_ref[...] + beta_ref[...]

    hc_ref[...] = _transform(wc_ref, bc_ref, gc_ref, betac_ref).astype(hc_ref.dtype)
    hp_ref[...] = _transform(wp_ref, bp_ref, gp_ref, betap_ref).astype(hp_ref.dtype)


def _dual_transform(x, char_p, pin_p, *, tm):
    """x: [N, H] bf16.  *_p = (w[H,H] bf16, b[1,H] f32, gamma[1,H] f32, beta[1,H] f32)."""
    N, H = x.shape
    Np = _round_up(N, tm)
    if Np != N:
        x = jnp.pad(x, ((0, Np - N), (0, 0)))
    wc, bc, gc, betac = char_p
    wp, bp, gp, betap = pin_p

    row_spec = pl.BlockSpec((tm, H), lambda i: (i, 0))
    mat_spec = pl.BlockSpec((H, H), lambda i: (0, 0))      # constant -> DMA'd once
    vec_spec = pl.BlockSpec((1, H), lambda i: (0, 0))

    cost = pl.CostEstimate(
        flops=4 * Np * H * H,
        transcendentals=2 * Np * H,
        bytes_accessed=3 * Np * H * 2 + 2 * (H * H * 2 + 3 * H * 4))

    hc, hp = pl.pallas_call(
        _dual_transform_kernel,
        out_shape=(jax.ShapeDtypeStruct((Np, H), jnp.bfloat16),
                   jax.ShapeDtypeStruct((Np, H), jnp.bfloat16)),
        grid_spec=pltpu.PrefetchScalarGridSpec(
            num_scalar_prefetch=0,
            grid=(Np // tm,),
            in_specs=[row_spec,
                      mat_spec, vec_spec, vec_spec, vec_spec,
                      mat_spec, vec_spec, vec_spec, vec_spec],
            out_specs=[row_spec, row_spec],
        ),
        compiler_params=pltpu.CompilerParams(
            dimension_semantics=("parallel",),
            vmem_limit_bytes=_VMEM_LIMIT),
        cost_estimate=cost,
    )(x, wc, bc, gc, betac, wp, bp, gp, betap)
    return hc[:N], hp[:N]


# ---------------------------------------------------------------------------
# K2: multi-head cross attention (no output projection, matching the module)
#     grid=(B,): fused lane-dense QKV projection + per-head softmax/context,
#     single lane-dense (1, S, H) output store.
# ---------------------------------------------------------------------------
def _cross_attention_kernel(qin_ref, kvin_ref, mask_ref,
                            wq_ref, bq_ref, wkv_ref, bkv_ref,
                            out_ref, *, num_heads):
    qin = qin_ref[0]                                        # (S, H) bf16
    kvin = kvin_ref[0]                                      # (S, H) bf16
    H = qin.shape[-1]
    dh = H // num_heads

    # Lane-dense fused projections.  Wq/bq are pre-scaled by 1/sqrt(dh);
    # Wkv = [Wk | Wv] so the KV input streams through the MXU once.
    q = (jnp.dot(qin, wq_ref[...], preferred_element_type=jnp.float32)
         + bq_ref[...]).astype(jnp.bfloat16)                # (S, H)
    kv = (jnp.dot(kvin, wkv_ref[...], preferred_element_type=jnp.float32)
          + bkv_ref[...]).astype(jnp.bfloat16)              # (S, 2H)
    k = kv[:, :H]
    v = kv[:, H:]
    mask = mask_ref[0]                                      # (1, S) additive per-key

    ctxs = []
    for h in range(num_heads):                              # static unroll
        sl = slice(h * dh, (h + 1) * dh)
        scores = lax.dot_general(q[:, sl], k[:, sl],
                                 (((1,), (1,)), ((), ())),
                                 preferred_element_type=jnp.float32)   # (S, S)
        scores = scores + mask
        m = jnp.max(scores, axis=-1, keepdims=True)
        e = jnp.exp(scores - m)
        p = e * pl.reciprocal(jnp.sum(e, axis=-1, keepdims=True), approx=True)
        # TODO(synk): attention-prob dropout omitted (inference / eval mode).
        ctxs.append(jnp.dot(p.astype(jnp.bfloat16), v[:, sl],
                            preferred_element_type=jnp.float32))       # (S, dh)

    # Heads concatenated in VMEM -> one lane-dense (1, S, H) store; no wrapper
    # transpose/reshape needed (matches torch permute(0,2,1,3).view).
    out_ref[...] = jnp.concatenate(ctxs, axis=-1).astype(out_ref.dtype)[None]


def _cross_attention(q_in, kv_in, mask, attn_p, *, num_heads):
    """q_in, kv_in: [B, S, H] bf16.  mask: [B, 1, S] f32 additive per-key.
    attn_p = (wq_scaled[H,H] bf16, bq_scaled[1,H] f32, wkv[H,2H] bf16, bkv[1,2H] f32)."""
    B, S, H = q_in.shape
    wq, bq, wkv, bkv = attn_p

    seq_spec = pl.BlockSpec((1, S, H), lambda b: (b, 0, 0))
    mask_spec = pl.BlockSpec((1, 1, S), lambda b: (b, 0, 0))
    wq_spec = pl.BlockSpec((H, H), lambda b: (0, 0))        # constant -> DMA'd once
    bq_spec = pl.BlockSpec((1, H), lambda b: (0, 0))
    wkv_spec = pl.BlockSpec((H, 2 * H), lambda b: (0, 0))
    bkv_spec = pl.BlockSpec((1, 2 * H), lambda b: (0, 0))
    out_spec = pl.BlockSpec((1, S, H), lambda b: (b, 0, 0))

    cost = pl.CostEstimate(
        flops=B * (6 * S * H * H + 4 * S * S * H),
        transcendentals=B * num_heads * S * S,
        bytes_accessed=B * (3 * S * H * 2 + S * 4) + 3 * H * H * 2)

    return pl.pallas_call(
        functools.partial(_cross_attention_kernel, num_heads=num_heads),
        out_shape=jax.ShapeDtypeStruct((B, S, H), jnp.bfloat16),
        grid_spec=pltpu.PrefetchScalarGridSpec(
            num_scalar_prefetch=0,
            grid=(B,),
            in_specs=[seq_spec, seq_spec, mask_spec,
                      wq_spec, bq_spec, wkv_spec, bkv_spec],
            out_specs=out_spec,
        ),
        compiler_params=pltpu.CompilerParams(
            dimension_semantics=("parallel",),
            vmem_limit_bytes=_VMEM_LIMIT),
        cost_estimate=cost,
    )(q_in, kv_in, mask, wq, bq, wkv, bkv)


# ---------------------------------------------------------------------------
# K3: lane-dense tiled linear (decoder head and fused phonetic heads)
#     Weights/biases arrive already bf16/f32 and 128-lane padded (prep-time).
# ---------------------------------------------------------------------------
def _linear_kernel(x_ref, w_ref, b_ref, o_ref):
    o = jnp.dot(x_ref[...], w_ref[...], preferred_element_type=jnp.float32)
    o_ref[...] = (o + b_ref[...]).astype(o_ref.dtype)


def _tiled_linear(x, w_pad, b_pad, *, tm, tn_max=256):
    """x: [N, H] bf16, w_pad: [H, Fp] bf16 (Fp % 128 == 0), b_pad: [1, Fp] f32
    -> [N, Fp] f32."""
    N, H = x.shape
    Fp = w_pad.shape[1]
    tn = _pick_col_tile(Fp, tn_max)
    Np = _round_up(N, tm)
    if Np != N:
        x = jnp.pad(x, ((0, Np - N), (0, 0)))

    cost = pl.CostEstimate(
        flops=2 * Np * H * Fp,
        transcendentals=0,
        bytes_accessed=Np * H * 2 + H * Fp * 2 + Np * Fp * 4)

    out = pl.pallas_call(
        _linear_kernel,
        out_shape=jax.ShapeDtypeStruct((Np, Fp), jnp.float32),
        grid_spec=pltpu.PrefetchScalarGridSpec(
            num_scalar_prefetch=0,
            grid=(Np // tm, Fp // tn),
            in_specs=[pl.BlockSpec((tm, H), lambda i, j: (i, 0)),
                      pl.BlockSpec((H, tn), lambda i, j: (0, j)),
                      pl.BlockSpec((1, tn), lambda i, j: (0, j))],
            out_specs=pl.BlockSpec((tm, tn), lambda i, j: (i, j)),
        ),
        compiler_params=pltpu.CompilerParams(
            dimension_semantics=("parallel", "parallel"),
            vmem_limit_bytes=_VMEM_LIMIT),
        cost_estimate=cost,
    )(x, w_pad, b_pad)
    return out[:N]


# ---------------------------------------------------------------------------
# Parameter preparation (done ONCE at load time, not per forward)
# ---------------------------------------------------------------------------
def prepare_params(params):
    H = params["t_char_w"].shape[0]
    nh = params["num_attention_heads"]
    dh = H // nh
    scale = 1.0 / math.sqrt(dh)
    V = params["decoder_w"].shape[1]

    prepped = {"num_attention_heads": nh, "hidden_size": H, "vocab_size": V}

    for name in ("t_char", "t_pin"):
        prepped[name] = (
            params[name + "_w"].astype(jnp.bfloat16),
            params[name + "_b"].reshape(1, H).astype(jnp.float32),
            params[name + "_gamma"].reshape(1, H).astype(jnp.float32),
            params[name + "_beta"].reshape(1, H).astype(jnp.float32))

    for name in ("p2c", "c2p"):
        wq = (params[name + "_wq"] * scale).astype(jnp.bfloat16)        # scale folded in
        bq = (params[name + "_bq"] * scale).reshape(1, H).astype(jnp.float32)
        wkv = jnp.concatenate([params[name + "_wk"], params[name + "_wv"]],
                              axis=1).astype(jnp.bfloat16)               # [H, 2H]
        bkv = jnp.concatenate([params[name + "_bk"], params[name + "_bv"]],
                              axis=0).reshape(1, 2 * H).astype(jnp.float32)
        prepped[name] = (wq, bq, wkv, bkv)

    Vp = _round_up(V, 128)
    prepped["decoder"] = (
        jnp.pad(params["decoder_w"], ((0, 0), (0, Vp - V))).astype(jnp.bfloat16),
        jnp.pad(params["decoder_b"], (0, Vp - V)).reshape(1, Vp).astype(jnp.float32))

    wh = jnp.concatenate([params["sm_w"], params["ym_w"], params["sd_w"]], axis=1)
    bh = jnp.concatenate([params["sm_b"], params["ym_b"], params["sd_b"]], axis=0)
    Fp = _round_up(HEADS_OUT, 128)
    prepped["heads"] = (
        jnp.pad(wh, ((0, 0), (0, Fp - HEADS_OUT))).astype(jnp.bfloat16),
        jnp.pad(bh, (0, Fp - HEADS_OUT)).reshape(1, Fp).astype(jnp.float32))

    return jax.tree_util.tree_map(
        lambda a: jax.device_put(a) if isinstance(a, jnp.ndarray) else a, prepped)


# ---------------------------------------------------------------------------
# Full forward
# ---------------------------------------------------------------------------
def attention_multitask_heads(sequence_output, prepped, attention_mask=None,
                              *, tm=256, tm_dec=512, tn_dec=256):
    """sequence_output: [B, S, H] f32.  attention_mask: optional additive [B, S].
    prepped: output of prepare_params().
    Returns (prediction_scores, sm_scores, ym_scores, sd_scores).
    Tiles: tm=128 on v5e; tm_dec up to 512/1024, tn_dec=256 for v6e/v7x decoder GEMM
    (keep tn_dec=128 on v5e's 128-wide MXU)."""
    B, S, H = sequence_output.shape
    nh = prepped["num_attention_heads"]
    V = prepped["vocab_size"]
    N = B * S
    tm = _pick_row_tile(N, tm, min_steps=8)       # keep >=8 grid steps for megacore
    tm_dec = _pick_row_tile(N, tm_dec)            # decoder grid has a big column axis

    x = sequence_output.reshape(N, H).astype(jnp.bfloat16)

    if attention_mask is None:
        mask = jnp.zeros((B, 1, S), jnp.float32)
    else:
        mask = attention_mask.reshape(B, 1, S).astype(jnp.float32)

    # 1) both BertPredictionHeadTransform's (fused, one x load)
    hc, hp = _dual_transform(x, prepped["t_char"], prepped["t_pin"], tm=tm)
    hc3 = hc.reshape(B, S, H)
    hp3 = hp.reshape(B, S, H)

    # 2) cross attentions (lane-dense fused QKV + per-head softmax/context)
    hidden_char = _cross_attention(hp3, hc3, mask, prepped["p2c"], num_heads=nh)
    hidden_pinyin = _cross_attention(hidden_char, hp3, mask, prepped["c2p"], num_heads=nh)

    # 3) LM decoder head (vocab column-tiled, padded to 128 lanes at prep time)
    dec_w, dec_b = prepped["decoder"]
    pred = _tiled_linear(hidden_char.reshape(N, H), dec_w, dec_b,
                         tm=tm_dec, tn_max=tn_dec)[:, :V]

    # 4) sm|ym|sd fused into one 128-lane padded matmul; sliced back here
    h_w, h_b = prepped["heads"]
    heads = _tiled_linear(hidden_pinyin.reshape(N, H), h_w, h_b, tm=tm)
    sm = heads[:, :SM_SIZE]
    ym = heads[:, SM_SIZE:SM_SIZE + YM_SIZE]
    sd = heads[:, SM_SIZE + YM_SIZE:HEADS_OUT]

    return (pred.reshape(B, S, V),
            sm.reshape(B, S, SM_SIZE),
            ym.reshape(B, S, YM_SIZE),
            sd.reshape(B, S, SD_SIZE))


# ---------------------------------------------------------------------------
# Parameters (JAX layout: linear weights stored as [in, out]) and reference
# ---------------------------------------------------------------------------
def init_params(key, hidden_size, num_heads, vocab_size):
    H = hidden_size
    ks = iter(jax.random.split(key, 32))
    std = 0.02

    def lin(din, dout):
        return (jax.random.normal(next(ks), (din, dout), jnp.float32) * std,
                jax.random.normal(next(ks), (dout,), jnp.float32) * std)

    p = {"num_attention_heads": num_heads}
    for name in ("t_char", "t_pin"):
        p[name + "_w"], p[name + "_b"] = lin(H, H)
        p[name + "_gamma"] = jnp.ones((H,), jnp.float32)
        p[name + "_beta"] = jnp.zeros((H,), jnp.float32)
    for name in ("p2c", "c2p"):
        for proj in ("q", "k", "v"):
            p[f"{name}_w{proj}"], p[f"{name}_b{proj}"] = lin(H, H)
    p["decoder_w"], p["decoder_b"] = lin(H, vocab_size)
    p["sm_w"], p["sm_b"] = lin(H, SM_SIZE)
    p["ym_w"], p["ym_b"] = lin(H, YM_SIZE)
    p["sd_w"], p["sd_b"] = lin(H, SD_SIZE)
    return p


def _reference(x, params, attention_mask=None):
    """Pure-JAX f32 reference (matches the PyTorch forward)."""
    B, S, H = x.shape
    nh = params["num_attention_heads"]
    dh = H // nh

    def transform(prefix):
        h = x @ params[prefix + "_w"] + params[prefix + "_b"]
        h = 0.5 * h * (1.0 + lax.erf(h / jnp.sqrt(2.0)))
        mean = jnp.mean(h, axis=-1, keepdims=True)
        var = jnp.mean((h - mean) ** 2, axis=-1, keepdims=True)
        h = (h - mean) / jnp.sqrt(var + LN_EPS)
        return h * params[prefix + "_gamma"] + params[prefix + "_beta"]

    def attn(prefix, q_in, kv_in):
        def split(t):
            return t.reshape(B, S, nh, dh).transpose(0, 2, 1, 3)
        q = split(q_in @ params[prefix + "_wq"] + params[prefix + "_bq"])
        k = split(kv_in @ params[prefix + "_wk"] + params[prefix + "_bk"])
        v = split(kv_in @ params[prefix + "_wv"] + params[prefix + "_bv"])
        scores = jnp.einsum("bhqd,bhkd->bhqk", q, k) / math.sqrt(dh)
        if attention_mask is not None:
            scores = scores + attention_mask.reshape(B, 1, 1, S)
        p = jax.nn.softmax(scores, axis=-1)
        ctx = jnp.einsum("bhqk,bhkd->bhqd", p, v)
        return ctx.transpose(0, 2, 1, 3).reshape(B, S, H)

    hc = transform("t_char")
    hp = transform("t_pin")
    hidden_char = attn("p2c", hp, hc)
    hidden_pinyin = attn("c2p", hidden_char, hp)
    pred = hidden_char @ params["decoder_w"] + params["decoder_b"]
    sm = hidden_pinyin @ params["sm_w"] + params["sm_b"]
    ym = hidden_pinyin @ params["ym_w"] + params["ym_b"]
    sd = hidden_pinyin @ params["sd_w"] + params["sd_b"]
    return pred, sm, ym, sd


if __name__ == "__main__":
    key = jax.random.PRNGKey(0)
    k_x, k_p = jax.random.split(key)

    B, S, H, NH, V = 2, 8, 32, 4, 64      # batch, seq, hidden, heads, vocab (small demo)
    sequence_output = jax.random.normal(k_x, (B, S, H), jnp.float32)
    params = init_params(k_p, H, NH, V)

    prepped = prepare_params(params)       # one-time weight repack/cast/pad
    outs = attention_multitask_heads(sequence_output, prepped, attention_mask=None)
    outs = jax.block_until_ready(outs)

    refs = _reference(sequence_output, params, attention_mask=None)
    names = ("prediction_scores", "sm_scores", "ym_scores", "sd_scores")
    shapes = ((B, S, V), (B, S, SM_SIZE), (B, S, YM_SIZE), (B, S, SD_SIZE))
    for name, got, ref, shp in zip(names, outs, refs, shapes):
        assert got.shape == shp, f"{name}: shape {got.shape} != {shp}"
        err = float(jnp.max(jnp.abs(got - ref)))
        # bf16 matmul operands with f32 accumulation -> loosened tolerance
        assert jnp.allclose(got, ref, atol=5e-3, rtol=3e-2), (
            f"{name} mismatch (max abs err {err:.2e})")

    print("KERNEL_OK")
</pallas_src>

<mosaic_0001>
module attributes {stable_mosaic.version = 11 : i64} {
  func.func @_dual_transform_kernel(%arg0: i32, %arg1: memref<16x32xbf16, #tpu.memory_space<vmem>>, %arg2: memref<32x32xbf16, #tpu.memory_space<vmem>>, %arg3: memref<1x32xf32, #tpu.memory_space<vmem>>, %arg4: memref<1x32xf32, #tpu.memory_space<vmem>>, %arg5: memref<1x32xf32, #tpu.memory_space<vmem>>, %arg6: memref<32x32xbf16, #tpu.memory_space<vmem>>, %arg7: memref<1x32xf32, #tpu.memory_space<vmem>>, %arg8: memref<1x32xf32, #tpu.memory_space<vmem>>, %arg9: memref<1x32xf32, #tpu.memory_space<vmem>>, %arg10: memref<16x32xbf16, #tpu.memory_space<vmem>>, %arg11: memref<16x32xbf16, #tpu.memory_space<vmem>>) attributes {dimension_semantics = [#tpu.dimension_semantics<parallel>], iteration_bounds = array<i64: 1>, scalar_prefetch = 0 : i64, scratch_operands = 0 : i64, tpu.core_type = #tpu.core_type<tc>, window_params = [{transform_indices = @transform_0, window_bounds = array<i64: 16, 32>}, {pipeline_mode = #tpu.pipeline_mode<synchronous>, transform_indices = @transform_1, window_bounds = array<i64: 32, 32>}, {pipeline_mode = #tpu.pipeline_mode<synchronous>, transform_indices = @transform_2, window_bounds = array<i64: 1, 32>}, {pipeline_mode = #tpu.pipeline_mode<synchronous>, transform_indices = @transform_3, window_bounds = array<i64: 1, 32>}, {pipeline_mode = #tpu.pipeline_mode<synchronous>, transform_indices = @transform_4, window_bounds = array<i64: 1, 32>}, {pipeline_mode = #tpu.pipeline_mode<synchronous>, transform_indices = @transform_5, window_bounds = array<i64: 32, 32>}, {pipeline_mode = #tpu.pipeline_mode<synchronous>, transform_indices = @transform_6, window_bounds = array<i64: 1, 32>}, {pipeline_mode = #tpu.pipeline_mode<synchronous>, transform_indices = @transform_7, window_bounds = array<i64: 1, 32>}, {pipeline_mode = #tpu.pipeline_mode<synchronous>, transform_indices = @transform_8, window_bounds = array<i64: 1, 32>}, {transform_indices = @transform_9, window_bounds = array<i64: 16, 32>}, {transform_indices = @transform_10, window_bounds = array<i64: 16, 32>}]} {
    %c0 = arith.constant 0 : index
    %c0_0 = arith.constant 0 : index
    %0 = vector.load %arg1[%c0, %c0_0] : memref<16x32xbf16, #tpu.memory_space<vmem>>, vector<16x32xbf16>
    %c0_1 = arith.constant 0 : index
    %c0_2 = arith.constant 0 : index
    %1 = vector.load %arg2[%c0_1, %c0_2] : memref<32x32xbf16, #tpu.memory_space<vmem>>, vector<32x32xbf16>
    %cst = arith.constant dense<0.000000e+00> : vector<16x32xf32>
    %2 = tpu.matmul %0, %1, %cst {dimension_numbers = #tpu.dot_dimension_numbers<[1], [0], [0], [1], [0, 0, 1, 1], [], []>} : vector<16x32xbf16>, vector<32x32xbf16>, vector<16x32xf32> -> vector<16x32xf32>
    %c0_3 = arith.constant 0 : index
    %c0_4 = arith.constant 0 : index
    %3 = vector.load %arg3[%c0_3, %c0_4] : memref<1x32xf32, #tpu.memory_space<vmem>>, vector<1x32xf32>
    %4 = vector.broadcast %3 : vector<1x32xf32> to vector<16x32xf32>
    %5 = arith.addf %2, %4 : vector<16x32xf32>
    %cst_5 = arith.constant 5.000000e-01 : f32
    %6 = vector.broadcast %cst_5 : f32 to vector<16x32xf32>
    %7 = arith.mulf %6, %5 : vector<16x32xf32>
    %cst_6 = arith.constant 0.707106769 : f32
    %8 = vector.broadcast %cst_6 : f32 to vector<16x32xf32>
    %9 = arith.mulf %5, %8 : vector<16x32xf32>
    %10 = math.erf %9 : vector<16x32xf32>
    %cst_7 = arith.constant 1.000000e+00 : f32
    %11 = vector.broadcast %cst_7 : f32 to vector<16x32xf32>
    %12 = arith.addf %11, %10 : vector<16x32xf32>
    %13 = arith.mulf %7, %12 : vector<16x32xf32>
    %cst_8 = arith.constant dense<0.000000e+00> : vector<16xf32>
    %14 = vector.multi_reduction <add>, %13, %cst_8 [1] : vector<16x32xf32> to vector<16xf32>
    %15 = vector.shape_cast %14 : vector<16xf32> to vector<16x1xf32>
    %cst_9 = arith.constant 3.200000e+01 : f32
    %16 = vector.broadcast %cst_9 : f32 to vector<16x1xf32>
    %17 = arith.divf %15, %16 : vector<16x1xf32>
    %18 = vector.broadcast %17 : vector<16x1xf32> to vector<16x32xf32>
    %19 = arith.subf %13, %18 : vector<16x32xf32>
    %20 = arith.mulf %19, %19 : vector<16x32xf32>
    %cst_10 = arith.constant dense<0.000000e+00> : vector<16xf32>
    %21 = vector.multi_reduction <add>, %20, %cst_10 [1] : vector<16x32xf32> to vector<16xf32>
    %22 = vector.shape_cast %21 : vector<16xf32> to vector<16x1xf32>
    %cst_11 = arith.constant 3.200000e+01 : f32
    %23 = vector.broadcast %cst_11 : f32 to vector<16x1xf32>
    %24 = arith.divf %22, %23 : vector<16x1xf32>
    %cst_12 = arith.constant 9.99999996E-13 : f32
    %25 = vector.broadcast %cst_12 : f32 to vector<16x1xf32>
    %26 = arith.addf %24, %25 : vector<16x1xf32>
    %27 = math.rsqrt %26 : vector<16x1xf32>
    %28 = vector.broadcast %27 : vector<16x1xf32> to vector<16x32xf32>
    %29 = arith.mulf %19, %28 : vector<16x32xf32>
    %c0_13 = arith.constant 0 : index
    %c0_14 = arith.constant 0 : index
    %30 = vector.load %arg4[%c0_13, %c0_14] : memref<1x32xf32, #tpu.memory_space<vmem>>, vector<1x32xf32>
    %31 = vector.broadcast %30 : vector<1x32xf32> to vector<16x32xf32>
    %32 = arith.mulf %29, %31 : vector<16x32xf32>
    %c0_15 = arith.constant 0 : index
    %c0_16 = arith.constant 0 : index
    %33 = vector.load %arg5[%c0_15, %c0_16] : memref<1x32xf32, #tpu.memory_space<vmem>>, vector<1x32xf32>
    %34 = vector.broadcast %33 : vector<1x32xf32> to vector<16x32xf32>
    %35 = arith.addf %32, %34 : vector<16x32xf32>
    %36 = arith.truncf %35 : vector<16x32xf32> to vector<16x32xbf16>
    %c0_17 = arith.constant 0 : index
    %c0_18 = arith.constant 0 : index
    %37 = vector.load %arg10[%c0_17, %c0_18] : memref<16x32xbf16, #tpu.memory_space<vmem>>, vector<16x32xbf16>
    tpu.vector_store %arg10[%c0_17, %c0_18], %36 {strides = array<i32>} : memref<16x32xbf16, #tpu.memory_space<vmem>>, vector<16x32xbf16>,
    %c0_19 = arith.constant 0 : index
    %c0_20 = arith.constant 0 : index
    %38 = vector.load %arg6[%c0_19, %c0_20] : memref<32x32xbf16, #tpu.memory_space<vmem>>, vector<32x32xbf16>
    %cst_21 = arith.constant dense<0.000000e+00> : vector<16x32xf32>
    %39 = tpu.matmul %0, %38, %cst_21 {dimension_numbers = #tpu.dot_dimension_numbers<[1], [0], [0], [1], [0, 0, 1, 1], [], []>} : vector<16x32xbf16>, vector<32x32xbf16>, vector<16x32xf32> -> vector<16x32xf32>
    %c0_22 = arith.constant 0 : index
    %c0_23 = arith.constant 0 : index
    %40 = vector.load %arg7[%c0_22, %c0_23] : memref<1x32xf32, #tpu.memory_space<vmem>>, vector<1x32xf32>
    %41 = vector.broadcast %40 : vector<1x32xf32> to vector<16x32xf32>
    %42 = arith.addf %39, %41 : vector<16x32xf32>
    %cst_24 = arith.constant 5.000000e-01 : f32
    %43 = vector.broadcast %cst_24 : f32 to vector<16x32xf32>
    %44 = arith.mulf %43, %42 : vector<16x32xf32>
    %cst_25 = arith.constant 0.707106769 : f32
    %45 = vector.broadcast %cst_25 : f32 to vector<16x32xf32>
    %46 = arith.mulf %42, %45 : vector<16x32xf32>
    %47 = math.erf %46 : vector<16x32xf32>
    %cst_26 = arith.constant 1.000000e+00 : f32
    %48 = vector.broadcast %cst_26 : f32 to vector<16x32xf32>
    %49 = arith.addf %48, %47 : vector<16x32xf32>
    %50 = arith.mulf %44, %49 : vector<16x32xf32>
    %cst_27 = arith.constant dense<0.000000e+00> : vector<16xf32>
    %51 = vector.multi_reduction <add>, %50, %cst_27 [1] : vector<16x32xf32> to vector<16xf32>
    %52 = vector.shape_cast %51 : vector<16xf32> to vector<16x1xf32>
    %cst_28 = arith.constant 3.200000e+01 : f32
    %53 = vector.broadcast %cst_28 : f32 to vector<16x1xf32>
    %54 = arith.divf %52, %53 : vector<16x1xf32>
    %55 = vector.broadcast %54 : vector<16x1xf32> to vector<16x32xf32>
    %56 = arith.subf %50, %55 : vector<16x32xf32>
    %57 = arith.mulf %56, %56 : vector<16x32xf32>
    %cst_29 = arith.constant dense<0.000000e+00> : vector<16xf32>
    %58 = vector.multi_reduction <add>, %57, %cst_29 [1] : vector<16x32xf32> to vector<16xf32>
    %59 = vector.shape_cast %58 : vector<16xf32> to vector<16x1xf32>
    %cst_30 = arith.constant 3.200000e+01 : f32
    %60 = vector.broadcast %cst_30 : f32 to vector<16x1xf32>
    %61 = arith.divf %59, %60 : vector<16x1xf32>
    %cst_31 = arith.constant 9.99999996E-13 : f32
    %62 = vector.broadcast %cst_31 : f32 to vector<16x1xf32>
    %63 = arith.addf %61, %62 : vector<16x1xf32>
    %64 = math.rsqrt %63 : vector<16x1xf32>
    %65 = vector.broadcast %64 : vector<16x1xf32> to vector<16x32xf32>
    %66 = arith.mulf %56, %65 : vector<16x32xf32>
    %c0_32 = arith.constant 0 : index
    %c0_33 = arith.constant 0 : index
    %67 = vector.load %arg8[%c0_32, %c0_33] : memref<1x32xf32, #tpu.memory_space<vmem>>, vector<1x32xf32>
    %68 = vector.broadcast %67 : vector<1x32xf32> to vector<16x32xf32>
    %69 = arith.mulf %66, %68 : vector<16x32xf32>
    %c0_34 = arith.constant 0 : index
    %c0_35 = arith.constant 0 : index
    %70 = vector.load %arg9[%c0_34, %c0_35] : memref<1x32xf32, #tpu.memory_space<vmem>>, vector<1x32xf32>
    %71 = vector.broadcast %70 : vector<1x32xf32> to vector<16x32xf32>
    %72 = arith.addf %69, %71 : vector<16x32xf32>
    %73 = arith.truncf %72 : vector<16x32xf32> to vector<16x32xbf16>
    %c0_36 = arith.constant 0 : index
    %c0_37 = arith.constant 0 : index
    %74 = vector.load %arg11[%c0_36, %c0_37] : memref<16x32xbf16, #tpu.memory_space<vmem>>, vector<16x32xbf16>
    tpu.vector_store %arg11[%c0_36, %c0_37], %73 {strides = array<i32>} : memref<16x32xbf16, #tpu.memory_space<vmem>>, vector<16x32xbf16>,
    return
  }
  func.func @transform_0(%arg0: i32) -> (i32, i32) {
    %c0_i32 = arith.constant 0 : i32
    %c0_i32_0 = arith.constant 0 : i32
    return %arg0, %c0_i32 : i32, i32
  }
  func.func @transform_1(%arg0: i32) -> (i32, i32) {
    %c0_i32 = arith.constant 0 : i32
    %c0_i32_0 = arith.constant 0 : i32
    %c0_i32_1 = arith.constant 0 : i32
    return %c0_i32, %c0_i32_0 : i32, i32
  }
  func.func @transform_2(%arg0: i32) -> (i32, i32) {
    %c0_i32 = arith.constant 0 : i32
    %c0_i32_0 = arith.constant 0 : i32
    %c0_i32_1 = arith.constant 0 : i32
    return %c0_i32, %c0_i32_0 : i32, i32
  }
  func.func @transform_3(%arg0: i32) -> (i32, i32) {
    %c0_i32 = arith.constant 0 : i32
    %c0_i32_0 = arith.constant 0 : i32
    %c0_i32_1 = arith.constant 0 : i32
    return %c0_i32, %c0_i32_0 : i32, i32
  }
  func.func @transform_4(%arg0: i32) -> (i32, i32) {
    %c0_i32 = arith.constant 0 : i32
    %c0_i32_0 = arith.constant 0 : i32
    %c0_i32_1 = arith.constant 0 : i32
    return %c0_i32, %c0_i32_0 : i32, i32
  }
  func.func @transform_5(%arg0: i32) -> (i32, i32) {
    %c0_i32 = arith.constant 0 : i32
    %c0_i32_0 = arith.constant 0 : i32
    %c0_i32_1 = arith.constant 0 : i32
    return %c0_i32, %c0_i32_0 : i32, i32
  }
  func.func @transform_6(%arg0: i32) -> (i32, i32) {
    %c0_i32 = arith.constant 0 : i32
    %c0_i32_0 = arith.constant 0 : i32
    %c0_i32_1 = arith.constant 0 : i32
    return %c0_i32, %c0_i32_0 : i32, i32
  }
  func.func @transform_7(%arg0: i32) -> (i32, i32) {
    %c0_i32 = arith.constant 0 : i32
    %c0_i32_0 = arith.constant 0 : i32
    %c0_i32_1 = arith.constant 0 : i32
    return %c0_i32, %c0_i32_0 : i32, i32
  }
  func.func @transform_8(%arg0: i32) -> (i32, i32) {
    %c0_i32 = arith.constant 0 : i32
    %c0_i32_0 = arith.constant 0 : i32
    %c0_i32_1 = arith.constant 0 : i32
    return %c0_i32, %c0_i32_0 : i32, i32
  }
  func.func @transform_9(%arg0: i32) -> (i32, i32) {
    %c0_i32 = arith.constant 0 : i32
    %c0_i32_0 = arith.constant 0 : i32
    return %arg0, %c0_i32 : i32, i32
  }
  func.func @transform_10(%arg0: i32) -> (i32, i32) {
    %c0_i32 = arith.constant 0 : i32
    %c0_i32_0 = arith.constant 0 : i32
    return %arg0, %c0_i32 : i32, i32
  }
}

</mosaic_0001>

<bundles_post_ra>
// kernel: tpu_custom_call.1
= control target key start
LH: loop header
LB: loop body
LE: loop exit
PB: predicated region body
PF: predicated region fallthrough
CT: control target
= control target key end

     0   :  { %16 = vsyncpa [#allocation3], 0  ;;  %s930_s0 = inlined_call_operand.hbm [shape: bf16[16,32], index: 0, kind: input, shape index: {}]   ;;  %s931_s1 = inlined_call_operand.hbm [shape: bf16[32,32], index: 1, kind: input, shape index: {}]   ;;  %s932_s2 = inlined_call_operand.vmem [shape: f32[1,32], index: 2, kind: input, shape index: {}]   ;;  %s933_s3 = inlined_call_operand.vmem [shape: f32[1,32], index: 3, kind: input, shape index: {}]   ;;  %s934_s4 = inlined_call_operand.vmem [shape: f32[1,32], index: 4, kind: input, shape index: {}]   ;;  %s935_s5 = inlined_call_operand.hbm [shape: bf16[32,32], index: 5, kind: input, shape index: {}]   ;;  %s936_s6 = inlined_call_operand.vmem [shape: f32[1,32], index: 6, kind: input, shape index: {}]   ;;  %s937_s7 = inlined_call_operand.vmem [shape: f32[1,32], index: 7, kind: input, shape index: {}]   ;;  %s938_s8 = inlined_call_operand.vmem [shape: f32[1,32], index: 8, kind: input, shape index: {}]   ;;  %s939_s9 = inlined_call_operand.hbm [shape: bf16[16,32], index: 9, kind: output, shape index: {0}]   ;;  %s940_s10 = inlined_call_operand.hbm [shape: bf16[16,32], index: 10, kind: output, shape index: {1}]  }
   0x1   :  { %17 = vsyncpa [#allocation6], 0 }
   0x2   :  { %18 = vsyncpa [#allocation4], 0 }
   0x3   :  { %19 = vsyncpa [#allocation10], 0  ;;  %s37_s15 = sshll.u32 %s931_s1, 4  ;;  %s696_s16 = smov [#allocation5]   ;;  %s38_s15 = int_to_ptr.hbm [resolvable:$true] %s37_s15 }
   0x4   :  { %s39_s17 = sshll.u32 %s696_s16, 4  ;;  %s24_s20 = sshll.u32 %s930_s0, 4  ;;  %s40_s17 = int_to_ptr.vmem [resolvable:$true] %s39_s17  ;;  %s25_s20 = int_to_ptr.hbm [resolvable:$true] %s24_s20 }
   0x5   :  { %s697_s21 = smov 64   ;;  %s698_s22 = smov 4  }
   0x6   :  { %45 = dma.hbm_to_vmem [thread:$0]  %s38_s15, 256, %s40_s17, [#allocation6], %s697_s21, %s697_s21, %s698_s22  }
   0x7   :  { %s699_s23 = smov [#allocation2]   ;;  %s56_s1 = sshll.u32 %s935_s5, 4  ;;  %s57_s1 = int_to_ptr.hbm [resolvable:$true] %s56_s1 }
   0x8   :  { %s26_s24 = sshll.u32 %s699_s23, 4  ;;  %s700_s0 = smov [#allocation7]   ;;  %s27_s24 = int_to_ptr.vmem [resolvable:$true] %s26_s24 }
   0x9   :  { %32 = dma.hbm_to_vmem [thread:$0]  %s25_s20, 128, %s27_s24, [#allocation3], %s697_s21, %s697_s21, %s698_s22  }
   0xa   :  { %s58_s27 = sshll.u32 %s700_s0, 4  ;;  %s59_s27 = int_to_ptr.vmem [resolvable:$true] %s58_s27 }
   0xb   :  { %64 = dma.hbm_to_vmem [thread:$0]  %s57_s1, 256, %s59_s27, [#allocation6], %s697_s21, %s697_s21, %s698_s22  }
   0xc   :  { %688 = dma.done.wait [#allocation3], 128  }
   0xd   :  { %689 = vsyncadd [#allocation3], 4294967168 }
   0xe   :  { %690 = dma.done.wait [#allocation6], 512  }
   0xf   :  { %691 = vsyncadd [#allocation6], 4294966784  ;;  %v533_v0 = vld [vmem:[#allocation5 + $0x8] sm:$0xff]  ;;  %v535_v1 = vld [vmem:[#allocation7 + $0x8] sm:$0xff]  ;;  %vm111_vm0 = vcmask 261120   ;;  %s486_s17 = sshll.u32 %s940_s10, 4  ;;  %s487_s17 = int_to_ptr.hbm [resolvable:$true] %s486_s17 }
  0x10   :  { %v532_v2 = vld [vmem:[#allocation5] sm:$0xff]  ;;  %121 = vmatpush.bf16.msra.mxu0 %v533_v0  ;;  %311 = vmatpush.bf16.msra.mxu1 %v535_v1  ;;  %v534_v3 = vld [vmem:[#allocation7] sm:$0xff]  ;;  %v531_v4 = vld [vmem:[#allocation2] sm:$0xff]  ;;  %s703_s18 = smov [#allocation8]   ;;  %s473_s24 = sshll.u32 %s939_s9, 4  ;;  %s474_s24 = int_to_ptr.hbm [resolvable:$true] %s473_s24 }
  0x11   :  { %v544_v5 = vld [vmem:[%s932_s2] ss:$0 sm:$0xff]  ;;  %s471_s19 = sshll.u32 %s703_s18, 4  ;;  %s472_s19 = int_to_ptr.vmem [resolvable:$true] %s471_s19 }
  0x12   :  { %v545_v6 = vld [vmem:[%s936_s6] ss:$0 sm:$0xff] }
  0x14   :  { %122 = vmatpush.bf16.msra.mxu0 %v532_v2  ;;  %312 = vmatpush.bf16.msra.mxu1 %v534_v3 }
  0x17   :  { %517 = vmatmul.msk.bf16.vlgmr.msra.gmra.mxu0 %vm111_vm0, %v531_v4  ;;  %528 = vmatmul.msk.bf16.vlgmr.msra.gmra.mxu1 %vm111_vm0, %v531_v4 }
  0x94   :  { %v124_v7 = vpop.f32.mrf.mxu0  ;;  %v314_v8 = vpop.f32.mrf.mxu1 }
  0x95   :  { %v785_v9 = vadd.f32 %v544_v5, %v124_v7  ;;  %v787_v10 = vadd.f32 %v545_v6, %v314_v8 }
  0x97   :  { %v790_v11 = vmul.f32 0.70710677, %v785_v9  ;;  %v793_v12 = vmul.f32 0.70710677, %v787_v10 }
  0x99   :  { %v133_v13 = vmul.f32 %v790_v11, %v790_v11  ;;  %v323_v14 = vmul.f32 %v793_v12, %v793_v12 }
  0x9b   :  { %v799_v15 = vmin.f32 %v133_v13, 16.0  ;;  %v801_v16 = vmin.f32 %v323_v14, 16.0 }
  0x9c   :  { %v126_v17 = vpop.f32.mrf.mxu0  ;;  %v316_v18 = vpop.f32.mrf.mxu1 }
  0x9d   :  { %v135_v19 = vmul.f32 2.1237322e-06, %v799_v15  ;;  %v325_v20 = vmul.f32 2.1237322e-06, %v801_v16  ;;  %v805_v21 = vadd.f32 %v544_v5, %v126_v17  ;;  %v807_v22 = vadd.f32 %v545_v6, %v316_v18 }
  0x9e   :  { %v336_v23 = vmul.f32 3.8918573e-05, %v801_v16  ;;  %v146_v24 = vmul.f32 3.8918573e-05, %v799_v15 }
  0x9f   :  { %v136_v25 = vadd.f32 0.00028619796, %v135_v19  ;;  %v326_v26 = vadd.f32 0.00028619796, %v325_v20  ;;  %v812_v27 = vmul.f32 0.70710677, %v805_v21 }
  0xa0   :  { %v815_v28 = vmul.f32 0.70710677, %v807_v22  ;;  %v337_v29 = vadd.f32 0.001143296, %v336_v23  ;;  %v147_v32 = vadd.f32 0.001143296, %v146_v24 }
  0xa1   :  { %v137_v30 = vmul.f32 %v136_v25, %v799_v15  ;;  %v327_v31 = vmul.f32 %v326_v26, %v801_v16  ;;  %v173_v33 = vmul.f32 %v812_v27, %v812_v27 }
  0xa2   :  { %v363_v34 = vmul.f32 %v815_v28, %v815_v28  ;;  %v338_v35 = vmul.f32 %v337_v29, %v801_v16  ;;  %v148_v38 = vmul.f32 %v147_v32, %v799_v15 }
  0xa3   :  { %v138_v36 = vadd.f32 0.0036580483, %v137_v30  ;;  %v328_v37 = vadd.f32 0.0036580483, %v327_v31  ;;  %v825_v39 = vmin.f32 %v173_v33, 16.0 }
  0xa4   :  { %v827_v40 = vmin.f32 %v363_v34, 16.0  ;;  %v339_v41 = vadd.f32 0.014752088, %v338_v35  ;;  %v149_v44 = vadd.f32 0.014752088, %v148_v38 }
  0xa5   :  { %v139_v42 = vmul.f32 %v138_v36, %v799_v15  ;;  %v329_v43 = vmul.f32 %v328_v37, %v801_v16  ;;  %v175_v45 = vmul.f32 2.1237322e-06, %v825_v39  ;;  %v186_v50 = vmul.f32 3.8918573e-05, %v825_v39 }
  0xa6   :  { %v365_v46 = vmul.f32 2.1237322e-06, %v827_v40  ;;  %v340_v47 = vmul.f32 %v339_v41, %v801_v16  ;;  %v376_v48 = vmul.f32 3.8918573e-05, %v827_v40  ;;  %v150_v49 = vmul.f32 %v149_v44, %v799_v15 }
  0xa7   :  { %v176_v51 = vadd.f32 0.00028619796, %v175_v45  ;;  %v140_v56 = vadd.f32 0.05243302, %v139_v42  ;;  %v330_v57 = vadd.f32 0.05243302, %v329_v43 }
  0xa8   :  { %v366_v52 = vadd.f32 0.00028619796, %v365_v46  ;;  %v341_v53 = vadd.f32 0.112945676, %v340_v47  ;;  %v151_v54 = vadd.f32 0.112945676, %v150_v49 }
  0xa9   :  { %v377_v55 = vadd.f32 0.001143296, %v376_v48  ;;  %v187_v59 = vadd.f32 0.001143296, %v186_v50  ;;  %v177_v63 = vmul.f32 %v176_v51, %v825_v39  ;;  %v141_v4 = vmul.f32 %v140_v56, %v799_v15 }
  0xaa   :  { %v342_v58 = vmul.f32 %v341_v53, %v801_v16  ;;  %v367_v60 = vmul.f32 %v366_v52, %v827_v40  ;;  %v152_v61 = vmul.f32 %v151_v54, %v799_v15  ;;  %v331_v5 = vmul.f32 %v330_v57, %v801_v16 }
  0xab   :  { %v378_v62 = vmul.f32 %v377_v55, %v827_v40  ;;  %v188_v1 = vmul.f32 %v187_v59, %v825_v39  ;;  %v178_v17 = vadd.f32 0.0036580483, %v177_v63  ;;  %v142_v24 = vadd.f32 0.18741608, %v141_v4 }
  0xac   :  { %v343_v0 = vadd.f32 0.4994258, %v342_v58  ;;  %v153_v2 = vadd.f32 0.4994258, %v152_v61  ;;  %v368_v8 = vadd.f32 0.0036580483, %v367_v60 }
  0xad   :  { %v379_v3 = vadd.f32 0.014752088, %v378_v62  ;;  %v189_v7 = vadd.f32 0.014752088, %v188_v1  ;;  %v332_v25 = vadd.f32 0.18741608, %v331_v5  ;;  %v179_v29 = vmul.f32 %v178_v17, %v825_v39 }
  0xae   :  { %v344_v6 = vmul.f32 %v343_v0, %v801_v16  ;;  %v154_v13 = vmul.f32 %v153_v2, %v799_v15  ;;  %v369_v26 = vmul.f32 %v368_v8, %v827_v40  ;;  %v143_v32 = vmul.f32 %v142_v24, %v799_v15 }
  0xaf   :  { %v380_v14 = vmul.f32 %v379_v3, %v827_v40  ;;  %v190_v23 = vmul.f32 %v189_v7, %v825_v39  ;;  %v333_v33 = vmul.f32 %v332_v25, %v801_v16  ;;  %v180_v38 = vadd.f32 0.05243302, %v179_v29 }
  0xb0   :  { %v345_v18 = vadd.f32 1.0, %v344_v6  ;;  %v155_v19 = vadd.f32 1.0, %v154_v13  ;;  %v370_v35 = vadd.f32 0.05243302, %v369_v26  ;;  %v144_v45 = vadd.f32 1.1283791, %v143_v32 }
  0xb1   :  { %v381_v20 = vadd.f32 0.112945676, %v380_v14  ;;  %v191_v31 = vadd.f32 0.112945676, %v190_v23  ;;  %v334_v46 = vadd.f32 1.1283791, %v333_v33  ;;  %v181_v50 = vmul.f32 %v180_v38, %v825_v39 }
  0xb2   :  { %550 = vrcp.f32 %v345_v18  ;;  %v371_v48 = vmul.f32 %v370_v35, %v827_v40  ;;  %v355_v51 = vand.u32 2147483647, %v345_v18  ;;  %v357_v52 = vand.u32 2147483648, %v345_v18 }
  0xb3   :  { %552 = vrcp.f32 %v155_v19  ;;  %v382_v30 = vmul.f32 %v381_v20, %v827_v40  ;;  %v192_v36 = vmul.f32 %v191_v31, %v825_v39  ;;  %v167_v55 = vand.u32 2147483648, %v155_v19 }
  0xb4   :  { %v165_v57 = vand.u32 2147483647, %v155_v19  ;;  %v335_v59 = vmul.f32 %v334_v46, %v793_v12  ;;  %v372_v60 = vadd.f32 0.18741608, %v371_v48  ;;  %vm351_vm3 = vweird.f32 %v345_v18 }
  0xb5   :  { %v383_v34 = vadd.f32 0.4994258, %v382_v30  ;;  %v193_v44 = vadd.f32 0.4994258, %v192_v36  ;;  %v358_v62 = vor.u32 1.1754944e-38, %v357_v52  ;;  %vm161_vm5 = vweird.f32 %v155_v19 }
  0xb6   :  { %v182_v0 = vadd.f32 0.18741608, %v181_v50  ;;  %vm356_vm6 = vcmp.eq.f32.partialorder %v355_v51, 8.507059e+37  ;;  %v168_v2 = vor.u32 1.1754944e-38, %v167_v55  ;;  %v145_v3 = vmul.f32 %v144_v45, %v790_v11 }
  0xb7   :  { %v384_v41 = vmul.f32 %v383_v34, %v827_v40  ;;  %v194_v16 = vmul.f32 %v193_v44, %v825_v39  ;;  %vm166_vm8 = vcmp.eq.f32.partialorder %v165_v57, 8.507059e+37  ;;  %v373_v6 = vmul.f32 %v372_v60, %v827_v40 }
  0xb8   :  { %v551_v37 = vpop.eup %550  ;;  %v183_v17 = vmul.f32 %v182_v0, %v825_v39  ;;  %v129_v20 = vmul.f32 0.5, %v785_v9  ;;  %v319_v25 = vmul.f32 0.5, %v787_v10  ;;  %v320_v51 = vmul.f32 0.5, %v807_v22 }
  0xb9   :  { %v553_v42 = vpop.eup %552  ;;  %v347_v43 = vmul.f32 %v551_v37, %v345_v18  ;;  %v857_v15 = vadd.f32 1.0, %v384_v41  ;;  %vm352_vm1 = vweird.f32 %v551_v37  ;;  %v862_v58 = vadd.f32 1.0, %v194_v16 }
  0xba   :  { %v157_v47 = vmul.f32 %v553_v42, %v155_v19  ;;  %vm162_vm2 = vweird.f32 %v553_v42  ;;  %vm353_vm4 = vmor %vm351_vm3, %vm352_vm1  ;;  %v374_v26 = vadd.f32 1.1283791, %v373_v6  ;;  %v184_v39 = vadd.f32 1.1283791, %v183_v17 }
  0xbb   :  { %v348_v49 = vsub.f32 1.0, %v347_v43  ;;  %554 = vrcp.f32 %v857_v15  ;;  %vm163_vm7 = vmor %vm161_vm5, %vm162_vm2  ;;  %v397_v11 = vand.u32 2147483648, %v857_v15  ;;  %v395_v32 = vand.u32 2147483647, %v857_v15 }
  0xbc   :  { %v158_v53 = vsub.f32 1.0, %v157_v47  ;;  %556 = vrcp.f32 %v862_v58  ;;  %vm391_vm10 = vweird.f32 %v857_v15  ;;  %v205_v41 = vand.u32 2147483647, %v862_v58 }
  0xbd   :  { %v349_v54 = vmul.f32 %v551_v37, %v348_v49  ;;  %v398_v36 = vor.u32 1.1754944e-38, %v397_v11  ;;  %vm396_vm13 = vcmp.eq.f32.partialorder %v395_v32, 8.507059e+37  ;;  %vm201_vm14 = vweird.f32 %v862_v58 }
  0xbe   :  { %v159_v56 = vmul.f32 %v553_v42, %v158_v53  ;;  %v185_v49 = vmul.f32 %v184_v39, %v812_v27  ;;  %vm206_vm1 = vcmp.eq.f32.partialorder %v205_v41, 8.507059e+37  ;;  %v130_v55 = vmul.f32 0.5, %v805_v21 }
  0xbf   :  { %v350_v61 = vadd.f32 %v551_v37, %v349_v54  ;;  %v701_v27 = vmov 32.0  }
  0xc0   :  { %v160_v63 = vadd.f32 %v553_v42, %v159_v56  ;;  %558 = vrcp.f32 %v701_v27 }
  0xc1   :  { %v354_v1 = vsel %vm353_vm4, %v551_v37, %v350_v61  ;;  %v555_v12 = vpop.eup %554  ;;  %v207_v37 = vand.u32 2147483648, %v862_v58 }
  0xc2   :  { %v359_v4 = vsel %vm356_vm6, %v358_v62, %v354_v1  ;;  %v164_v5 = vsel %vm163_vm7, %v553_v42, %v160_v63  ;;  %v387_v14 = vmul.f32 %v555_v12, %v857_v15  ;;  %v557_v19 = vpop.eup %556  ;;  %vm392_vm9 = vweird.f32 %v555_v12 }
  0xc3   :  { %v360_v7 = vmul.f32 %v359_v4, %v335_v59  ;;  %v169_v8 = vsel %vm166_vm8, %v168_v2, %v164_v5  ;;  %v197_v40 = vmul.f32 %v557_v19, %v862_v58  ;;  %vm393_vm11 = vmor %vm391_vm10, %vm392_vm9  ;;  %vm202_vm12 = vweird.f32 %v557_v19 }
  0xc4   :  { %v170_v13 = vmul.f32 %v169_v8, %v145_v3  ;;  %v388_v24 = vsub.f32 1.0, %v387_v14  ;;  %v375_v42 = vmul.f32 %v374_v26, %v815_v28  ;;  %vm203_vm15 = vmor %vm201_vm14, %vm202_vm12  ;;  %v208_v48 = vor.u32 1.1754944e-38, %v207_v37 }
  0xc5   :  { %v529_v18 = vclamps-f32 %v360_v7, 1.0  ;;  %v198_v9 = vsub.f32 1.0, %v197_v40  ;;  %vm282_vm8 = vcmask 257024  }
  0xc6   :  { %v518_v23 = vclamps-f32 %v170_v13, 1.0  ;;  %v389_v31 = vmul.f32 %v555_v12, %v388_v24  ;;  %v559_v60 = vpop.eup %558 }
  0xc7   :  { %v403_v29 = vadd.f32 1.0, %v529_v18  ;;  %v199_v38 = vmul.f32 %v557_v19, %v198_v9  ;;  %v224_v61 = vmul.f32 32.0, %v559_v60  ;;  %vm228_vm2 = vweird.f32 %v559_v60 }
  0xc8   :  { %v213_v30 = vadd.f32 1.0, %v518_v23  ;;  %v390_v35 = vadd.f32 %v555_v12, %v389_v31 }
  0xc9   :  { %v405_v33 = vmul.f32 %v403_v29, %v319_v25  ;;  %v200_v46 = vadd.f32 %v557_v19, %v199_v38  ;;  %v225_v62 = vsub.f32 1.0, %v224_v61 }
  0xca   :  { %v215_v34 = vmul.f32 %v213_v30, %v129_v20  ;;  %v394_v44 = vsel %vm393_vm11, %v555_v12, %v390_v35 }
  0xcb   :  { %v407_v10 = vsel %vm111_vm0, %v405_v33, 0.0  ;;  %v399_v45 = vsel %vm396_vm13, %v398_v36, %v394_v44  ;;  %v204_v15 = vsel %vm203_vm15, %v557_v19, %v200_v46  ;;  %v226_v63 = vmul.f32 %v559_v60, %v225_v62 }
  0xcc   :  { %408 = vadd.xlane.f32.xlu1 %v407_v10  ;;  %v217_v43 = vsel %vm111_vm0, %v215_v34, 0.0  ;;  %v400_v47 = vmul.f32 %v399_v45, %v375_v42  ;;  %v209_v50 = vsel %vm206_vm1, %v208_v48, %v204_v15  ;;  %v547_v15 = vld [vmem:[%s937_s7] ss:$0 sm:$0xff] }
  0xcd   :  { %218 = vadd.xlane.f32.xlu0 %v217_v43  ;;  %v210_v28 = vmul.f32 %v209_v50, %v185_v49  ;;  %v227_v22 = vadd.f32 %v559_v60, %v226_v63  ;;  %v546_v50 = vld [vmem:[%s933_s3] ss:$0 sm:$0xff]  ;;  %s702_s3 = smov [#allocation9]  }
  0xce   :  { %v530_v16 = vclamps-f32 %v400_v47, 1.0 }
  0xcf   :  { %v519_v53 = vclamps-f32 %v210_v28, 1.0  ;;  %v229_v0 = vsel %vm228_vm2, %v559_v60, %v227_v22 }
  0xd0   :  { %v404_v52 = vadd.f32 1.0, %v530_v16 }
  0xd1   :  { %v214_v56 = vadd.f32 1.0, %v519_v53 }
  0xd2   :  { %v406_v54 = vmul.f32 %v404_v52, %v320_v51 }
  0xd3   :  { %v216_v58 = vmul.f32 %v214_v56, %v130_v55  ;;  %v548_v56 = vld [vmem:[%s934_s4] ss:$0 sm:$0xff]  ;;  %s484_s4 = sshll.u32 %s702_s3, 4  ;;  %s485_s4 = int_to_ptr.vmem [resolvable:$true] %s484_s4 }
  0xd4   :  { %v410_v57 = vsel %vm111_vm0, %v406_v54, 0.0 }
  0xd5   :  { %411 = vadd.xlane.f32.xlu1 %v410_v57  ;;  %v220_v59 = vsel %vm111_vm0, %v216_v58, 0.0 }
  0xd6   :  { %221 = vadd.xlane.f32.xlu0 %v220_v59 }
 0x13f   :  { %v409_v1 = vpop.xlane.xlu1 %408 }
 0x140   :  { %v413_v2 = vmul.f32 %v409_v1, %v229_v0  ;;  %v219_v21 = vpop.xlane.xlu0 %218 }
 0x141   :  { %v230_v3 = vmul.f32 %v229_v0, %v219_v21 }
 0x142   :  { %v415_v4 = vsub.f32 %v405_v33, %v413_v2 }
 0x143   :  { %v232_v5 = vsub.f32 %v215_v34, %v230_v3 }
 0x144   :  { %v417_v12 = vmul.f32 %v415_v4, %v415_v4 }
 0x145   :  { %v234_v6 = vmul.f32 %v232_v5, %v232_v5 }
 0x146   :  { %v419_v7 = vsel %vm111_vm0, %v417_v12, 0.0 }
 0x147   :  { %420 = vadd.xlane.f32.xlu0 %v419_v7  ;;  %v236_v8 = vsel %vm111_vm0, %v234_v6, 0.0 }
 0x148   :  { %237 = vadd.xlane.f32.xlu2 %v236_v8  ;;  %v412_v13 = vpop.xlane.xlu1 %411 }
 0x149   :  { %v414_v14 = vmul.f32 %v412_v13, %v229_v0  ;;  %v222_v18 = vpop.xlane.xlu0 %221 }
 0x14a   :  { %v231_v19 = vmul.f32 %v229_v0, %v222_v18 }
 0x14b   :  { %v890_v17 = vsub.f32 %v406_v54, %v414_v14  ;;  %v549_v54 = vld [vmem:[%s938_s8] ss:$0 sm:$0xff] }
 0x14c   :  { %v894_v23 = vsub.f32 %v216_v58, %v231_v19 }
 0x14d   :  { %v418_v20 = vmul.f32 %v890_v17, %v890_v17 }
 0x14e   :  { %v235_v11 = vmul.f32 %v894_v23, %v894_v23 }
 0x14f   :  { %v422_v24 = vsel %vm111_vm0, %v418_v20, 0.0 }
 0x150   :  { %423 = vadd.xlane.f32.xlu1 %v422_v24  ;;  %v239_v25 = vsel %vm111_vm0, %v235_v11, 0.0 }
 0x151   :  { %240 = vadd.xlane.f32.xlu2 %v239_v25 }
 0x1ba   :  { %v421_v26 = vpop.xlane.xlu0 %420 }
 0x1bb   :  { %v238_v29 = vpop.xlane.xlu2 %237  ;;  %v425_v40 = vmul.f32 %v421_v26, %v229_v0 }
 0x1bc   :  { %v242_v30 = vmul.f32 %v238_v29, %v229_v0 }
 0x1bd   :  { %v427_v31 = vadd.f32 1e-12, %v425_v40 }
 0x1be   :  { %v244_v32 = vadd.f32 1e-12, %v242_v30 }
 0x1bf   :  { %560 = vrsqrt.f32 %v427_v31  ;;  %vm435_vm4 = vweird.f32 %v427_v31 }
 0x1c0   :  { %562 = vrsqrt.f32 %v244_v32  ;;  %vm252_vm5 = vweird.f32 %v244_v32 }
 0x1c3   :  { %v424_v33 = vpop.xlane.xlu1 %423 }
 0x1c4   :  { %v426_v35 = vmul.f32 %v424_v33, %v229_v0  ;;  %v241_v38 = vpop.xlane.xlu2 %240 }
 0x1c5   :  { %v561_v39 = vpop.eup %560  ;;  %v243_v42 = vmul.f32 %v241_v38, %v229_v0 }
 0x1c6   :  { %v563_v9 = vpop.eup %562  ;;  %v430_v34 = vmul.f32 %v561_v39, %v427_v31  ;;  %v428_v10 = vadd.f32 1e-12, %v426_v35  ;;  %vm436_vm0 = vweird.f32 %v561_v39 }
 0x1c7   :  { %v247_v36 = vmul.f32 %v563_v9, %v244_v32  ;;  %v245_v45 = vadd.f32 1e-12, %v243_v42  ;;  %vm253_vm3 = vweird.f32 %v563_v9  ;;  %vm437_vm6 = vmor %vm435_vm4, %vm436_vm0 }
 0x1c8   :  { %v431_v37 = vmul.f32 %v561_v39, %v430_v34  ;;  %564 = vrsqrt.f32 %v428_v10  ;;  %vm254_vm7 = vmor %vm252_vm5, %vm253_vm3  ;;  %vm445_vm10 = vweird.f32 %v428_v10 }
 0x1c9   :  { %v248_v41 = vmul.f32 %v563_v9, %v247_v36  ;;  %566 = vrsqrt.f32 %v245_v45  ;;  %vm262_vm13 = vweird.f32 %v245_v45 }
 0x1ca   :  { %v432_v43 = vmul.f32 0.5, %v431_v37 }
 0x1cb   :  { %v249_v44 = vmul.f32 0.5, %v248_v41 }
 0x1cc   :  { %v433_v46 = vsub.f32 1.5, %v432_v43 }
 0x1cd   :  { %v250_v47 = vsub.f32 1.5, %v249_v44 }
 0x1ce   :  { %v434_v48 = vmul.f32 %v561_v39, %v433_v46  ;;  %v565_v16 = vpop.eup %564 }
 0x1cf   :  { %v251_v49 = vmul.f32 %v563_v9, %v250_v47  ;;  %v440_v53 = vmul.f32 %v565_v16, %v428_v10  ;;  %v567_v57 = vpop.eup %566  ;;  %vm446_vm9 = vweird.f32 %v565_v16 }
 0x1d0   :  { %v438_v28 = vsel %vm437_vm6, %v561_v39, %v434_v48  ;;  %v257_v60 = vmul.f32 %v567_v57, %v245_v45  ;;  %vm447_vm11 = vmor %vm445_vm10, %vm446_vm9  ;;  %vm263_vm12 = vweird.f32 %v567_v57 }
 0x1d1   :  { %v255_v51 = vsel %vm254_vm7, %v563_v9, %v251_v49  ;;  %v449_v52 = vmul.f32 %v438_v28, %v415_v4  ;;  %v441_v59 = vmul.f32 %v565_v16, %v440_v53  ;;  %vm264_vm14 = vmor %vm262_vm13, %vm263_vm12 }
 0x1d2   :  { %v266_v55 = vmul.f32 %v255_v51, %v232_v5  ;;  %v258_v63 = vmul.f32 %v567_v57, %v257_v60 }
 0x1d3   :  { %v455_v58 = vmul.f32 %v547_v15, %v449_v52  ;;  %v442_v61 = vmul.f32 0.5, %v441_v59 }
 0x1d4   :  { %v272_v27 = vmul.f32 %v546_v50, %v266_v55  ;;  %v259_v2 = vmul.f32 0.5, %v258_v63 }
 0x1d5   :  { %v461_v62 = vadd.f32 %v549_v54, %v455_v58  ;;  %v443_v0 = vsub.f32 1.5, %v442_v61 }
 0x1d6   :  { %v278_v22 = vadd.f32 %v548_v56, %v272_v27  ;;  %v260_v4 = vsub.f32 1.5, %v259_v2 }
 0x1d7   :  { %v463_v1 = vpack.c.bf16 %v461_v62, %v461_v62  ;;  %v444_v3 = vmul.f32 %v565_v16, %v443_v0 }
 0x1d8   :  { %v280_v21 = vpack.c.bf16 %v278_v22, %v278_v22  ;;  %v261_v6 = vmul.f32 %v567_v57, %v260_v4 }
 0x1d9   :  { %465 = vst.msk [vmem:[#allocation9] sm:$0xf] %vm282_vm8, %v463_v1  ;;  %v448_v5 = vsel %vm447_vm11, %v565_v16, %v444_v3 }
 0x1da   :  { %283 = vst.msk [vmem:[#allocation8] sm:$0xf] %vm282_vm8, %v280_v21  ;;  %v450_v12 = vmul.f32 %v448_v5, %v890_v17  ;;  %v265_v8 = vsel %vm264_vm14, %v567_v57, %v261_v6 }
 0x1db   :  { %v267_v13 = vmul.f32 %v265_v8, %v894_v23 }
 0x1dc   :  { %v456_v7 = vmul.f32 %v547_v15, %v450_v12 }
 0x1dd   :  { %v273_v18 = vmul.f32 %v546_v50, %v267_v13 }
 0x1de   :  { %v462_v14 = vadd.f32 %v549_v54, %v456_v7 }
 0x1df   :  { %v279_v19 = vadd.f32 %v548_v56, %v273_v18 }
 0x1e0   :  { %v464_v17 = vpack.c.bf16 %v462_v14, %v462_v14 }
 0x1e1   :  { %v281_v20 = vpack.c.bf16 %v279_v19, %v279_v19 }
 0x1e2   :  { %466 = vst.msk [vmem:[#allocation9 + $0x4] sm:$0xf] %vm282_vm8, %v464_v17 }
 0x1e3   :  { %492 = dma.vmem_to_hbm [thread:$0]  %s485_s4, 128, %s487_s17, [#allocation10], %s697_s21, %s697_s21, %s698_s22   ;;  %284 = vst.msk [vmem:[#allocation8 + $0x4] sm:$0xf] %vm282_vm8, %v281_v20 }
 0x1e4   :  { %479 = dma.vmem_to_hbm [thread:$0]  %s472_s19, 128, %s474_s24, [#allocation4], %s697_s21, %s697_s21, %s698_s22  }
 0x1e5   :  { %692 = dma.done.wait [#allocation4], 128  }
 0x1e6   :  { %693 = vsyncadd [#allocation4], 4294967168 }
 0x1e7   :  { %694 = dma.done.wait [#allocation10], 128  }
 0x1e8   :  { %695 = vsyncadd [#allocation10], 4294967168 }
 0x1e9   :  { %501 = vsyncpa [#allocation3], 1 }
 0x1ea   :  { %502 = vsyncpa [#allocation6], 1 }
 0x1eb   :  { %503 = vsyncpa [#allocation4], 1 }
 0x1ec   :  { %504 = vsyncpa [#allocation10], 1 }

</bundles_post_ra>
